<compile_context>
chip_gen: v7x
topology: tpu7x:2x2x1
jax: 0.10.0
libtpu: 0.0.40
codegen_flags: <defaults>
</compile_context>

<pallas_src>
import functools

import jax
import jax.numpy as jnp
from jax import lax
from jax.experimental import pallas as pl
from jax.experimental.pallas import tpu as pltpu


# ----------------------------------------------------------------------------- kernel
def _self_attn_kernel(gamma_ref,                 # SMEM (1, 1) f32
                      xt_ref,                    # (1, Tj, C)   f32   x column tile (residual + K input)
                      qt_ref,                    # (1, Cq, Npad) bf16 Q^T, resident across j
                      v_ref,                     # (1, Npad, C) bf16  V,   resident across j
                      wk_ref, bk_ref,            # (C, Cq) bf16, (1, Cq) f32
                      out_ref,                   # (1, Tj, C)   f32
                      attn_ref=None,             # (1, Tj, Npad) attn_dtype (optional)
                      *, n_real, n_pad, exp_dtype):
    f32 = jnp.float32
    bf16 = jnp.bfloat16

    xt = xt_ref[0]                               # (Tj, C) f32
    tj = xt.shape[0]

    # K projection for this column tile only (1x1 conv == channel matmul).
    k = jnp.dot(xt.astype(bf16), wk_ref[...],
                preferred_element_type=f32) + bk_ref[...]            # (Tj, Cq) f32

    # Scores directly in attention-map orientation: s_t[j, i] = k_j . q_i == S[i, j].
    # Q^T is (Cq, Npad) so this is a plain (M,K)x(K,N) MXU matmul, lane-dense along i.
    s_t = jnp.dot(k.astype(bf16), qt_ref[0],
                  preferred_element_type=f32)                        # (Tj, Npad) f32

    if n_pad > n_real:
        # Mask padded source tokens i out of the softmax denominator.
        i_idx = lax.broadcasted_iota(jnp.int32, (tj, n_pad), 1)
        s_t = jnp.where(i_idx < n_real, s_t, jnp.float32(-1e30))

    # softmax over i (last axis here) == softmax(S, axis=-2) in the reference.
    m = jnp.max(s_t, axis=-1, keepdims=True)                         # f32
    e = jnp.exp((s_t - m).astype(exp_dtype))                         # (Tj, Npad)
    e_f = e.astype(f32)
    l = jnp.sum(e_f, axis=-1, keepdims=True)                         # f32 row sum
    inv_l = 1.0 / l                                                  # exact reciprocal, (Tj,1) -> cheap

    # o[j, c] = sum_i a_map[j, i] * V[i, c]; normalization deferred so the
    # unnormalized (bf16) `e` feeds the MXU directly.
    o = jnp.dot(e.astype(bf16), v_ref[0],
                preferred_element_type=f32) * inv_l                  # (Tj, C) f32

    gamma = gamma_ref[0, 0]
    # NOTE: masked vst when C < 128 (residual store) -- negligible vs attn traffic.
    out_ref[0] = xt + gamma * o
    if attn_ref is not None:
        attn_ref[0] = (e_f * inv_l).astype(attn_ref.dtype)


# ----------------------------------------------------------------------------- planning
def _round_up(x, m):
    return ((x + m - 1) // m) * m


def _tpu_flavor():
    """(vmem_limit_bytes, max_tile, bf16_eup) derived from the local TPU generation."""
    kind = ""
    try:
        kind = jax.devices()[0].device_kind.lower()
    except Exception:
        pass
    bf16_eup = ("v6" in kind) or ("v7" in kind)          # v5e has no bf16 EUP/VPU
    vmem_cap = None
    try:
        vmem_cap = int(pltpu.get_tpu_info().vmem_capacity_bytes)
    except Exception:
        vmem_cap = None
    if vmem_cap is None:
        vmem_cap = (64 if "v7" in kind else 128) * 1024 * 1024
    if vmem_cap >= 100 * 1024 * 1024:                    # v5e / v6e: 128 MiB physical
        return 100 * 1024 * 1024, 1024, bf16_eup
    return 48 * 1024 * 1024, 512, bf16_eup               # v7x: 64 MiB/TC, leave headroom


def _choose_tile(n, c, cq, attn_bytes, vmem_limit, max_tile):
    """Pick (Tj, Npad): column-tile size and padded token count (Tj divides Npad)."""
    cands = [t for t in (1024, 512, 256, 128) if t <= max_tile]
    if n <= cands[-1]:
        t = _round_up(max(n, 8), 8)                      # single tile, sublane aligned
        return t, t
    budget = int(0.8 * vmem_limit)

    def live(tj, npad):
        # Rough per-step live set: double-buffered blocks + f32 softmax intermediates.
        blocks = 2 * (tj * npad * attn_bytes + 2 * tj * c * 4
                      + npad * c * 2 + npad * cq * 2)
        return blocks + tj * npad * 12

    best = None
    for t in cands:
        npad = _round_up(n, t)
        key = (0 if live(t, npad) <= budget else 1, npad, -t)
        if best is None or key < best[0]:
            best = (key, t, npad)
    return best[1], best[2]


# ----------------------------------------------------------------------------- wrapper
def self_attention_pallas(x_nchw, wq, bq, wk, bk, wv, bv, gamma,
                          *, attn_dtype=jnp.float32, return_attn=True):
    """x_nchw: (B, C, H, W) f32.  wq/wk: (C, C//8), wv: (C, C), biases (1, Cdim)."""
    B, C, H, W = x_nchw.shape
    N = H * W
    Cq = wq.shape[1]
    f32, bf16 = jnp.float32, jnp.bfloat16

    vmem_limit, max_tile, bf16_eup = _tpu_flavor()
    exp_dtype = bf16 if bf16_eup else f32                # bf16 EUP exp only on v6e/v7x
    attn_bytes = jnp.dtype(attn_dtype).itemsize if return_attn else 0
    Tj, Npad = _choose_tile(N, C, Cq, attn_bytes, vmem_limit, max_tile)
    NJ = Npad // Tj

    # NCHW -> (B, N, C) token layout; pad token axis to Npad (masked in kernel).
    x_cl = jnp.transpose(x_nchw, (0, 2, 3, 1)).reshape(B, N, C).astype(f32)
    if Npad > N:
        x_cl = jnp.pad(x_cl, ((0, 0), (0, Npad - N), (0, 0)))

    # Q / V projections hoisted out of the per-tile kernel (computed once, in XLA).
    # Q is pre-transposed to (B, Cq, Npad): lane-dense along the token (i) axis.
    q_t = jnp.transpose(x_cl @ wq.astype(f32) + bq, (0, 2, 1)).astype(bf16)   # (B, Cq, Npad)
    v_b = (x_cl @ wv.astype(f32) + bv).astype(bf16)                           # (B, Npad, C)

    wk_b = wk.astype(bf16)
    bk_f = bk.astype(f32).reshape(1, Cq)
    gamma_arr = jnp.asarray(gamma, f32).reshape(1, 1)

    kernel = functools.partial(_self_attn_kernel,
                               n_real=N, n_pad=Npad, exp_dtype=exp_dtype)

    out_shapes = [jax.ShapeDtypeStruct((B, Npad, C), f32)]
    out_specs = [pl.BlockSpec((1, Tj, C), lambda b, j: (b, j, 0))]
    if return_attn:
        out_shapes.append(jax.ShapeDtypeStruct((B, Npad, Npad), attn_dtype))
        out_specs.append(pl.BlockSpec((1, Tj, Npad), lambda b, j: (b, j, 0)))

    full = lambda shape: pl.BlockSpec(shape, lambda b, j: (0,) * len(shape))

    # Cost hint: kernel-side work only (Q/V projections now live in XLA).
    flops = 2 * B * (Npad * C * Cq + Npad * Npad * (Cq + C))
    bytes_accessed = (B * Npad * C * (4 + 2 + 4)          # x tile in + V in + out
                      + B * Cq * Npad * 2                 # Q^T in
                      + B * Npad * Npad * attn_bytes      # attention-map writeback
                      + C * Cq * 2 + Cq * 4)

    results = pl.pallas_call(
        kernel,
        out_shape=tuple(out_shapes),
        grid=(B, NJ),
        in_specs=[
            pl.BlockSpec(memory_space=pltpu.SMEM),                 # gamma scalar
            pl.BlockSpec((1, Tj, C), lambda b, j: (b, j, 0)),      # x column tile (f32)
            pl.BlockSpec((1, Cq, Npad), lambda b, j: (b, 0, 0)),   # Q^T (bf16, j-resident)
            pl.BlockSpec((1, Npad, C), lambda b, j: (b, 0, 0)),    # V   (bf16, j-resident)
            full((C, Cq)), full((1, Cq)),                          # wk, bk
        ],
        out_specs=tuple(out_specs),
        compiler_params=pltpu.CompilerParams(
            dimension_semantics=("parallel", "parallel"),          # no cross-step carry
            vmem_limit_bytes=vmem_limit),
        cost_estimate=pl.CostEstimate(
            flops=flops, transcendentals=B * Npad * Npad,
            bytes_accessed=bytes_accessed),
    )(gamma_arr, x_cl, q_t, v_b, wk_b, bk_f)

    if return_attn:
        out_cl, attn_p = results
    else:
        (out_cl,) = results

    out_cl = out_cl[:, :N, :]
    out = jnp.transpose(out_cl.reshape(B, H, W, C), (0, 3, 1, 2))
    if return_attn:
        return out, attn_p[:, :N, :N]
    return out


# ----------------------------------------------------------------------------- reference
def self_attention_ref(x_nchw, wq, bq, wk, bk, wv, bv, gamma):
    """Pure-JAX f32 reference mirroring the PyTorch forward."""
    B, C, H, W = x_nchw.shape
    N = H * W
    x_cl = jnp.transpose(x_nchw, (0, 2, 3, 1)).reshape(B, N, C)
    q = x_cl @ wq + bq                                   # (B, N, Cq)
    k = x_cl @ wk + bk                                   # (B, N, Cq)
    v = x_cl @ wv + bv                                   # (B, N, C)
    s = jnp.einsum('bic,bjc->bij', q, k)                 # (B, N, N)
    a_t = jax.nn.softmax(s, axis=-2)
    attn = jnp.transpose(a_t, (0, 2, 1))
    o = jnp.einsum('bij,bic->bjc', a_t, v)               # (B, N, C)
    out_cl = x_cl + gamma * o
    out = jnp.transpose(out_cl.reshape(B, H, W, C), (0, 3, 1, 2))
    return out, attn


# ----------------------------------------------------------------------------- main
def _run_case(x, wq, bq, wk, bk, wv, bv, gamma, **kw):
    fn = jax.jit(functools.partial(self_attention_pallas, **kw))
    res = fn(x, wq, bq, wk, bk, wv, bv, gamma)
    jax.block_until_ready(res)
    return res


if __name__ == "__main__":
    key = jax.random.PRNGKey(0)

    def make_inputs(k, B, C, H, W):
        Cq = max(C // 8, 1)
        kx, kwq, kbq, kwk, kbk, kwv, kbv = jax.random.split(k, 7)
        scale = 1.0 / float(jnp.sqrt(C))
        x = jax.random.normal(kx, (B, C, H, W), jnp.float32)
        wq = jax.random.uniform(kwq, (C, Cq), jnp.float32, -scale, scale)
        bq = jax.random.uniform(kbq, (1, Cq), jnp.float32, -scale, scale)
        wk = jax.random.uniform(kwk, (C, Cq), jnp.float32, -scale, scale)
        bk = jax.random.uniform(kbk, (1, Cq), jnp.float32, -scale, scale)
        wv = jax.random.uniform(kwv, (C, C), jnp.float32, -scale, scale)
        bv = jax.random.uniform(kbv, (1, C), jnp.float32, -scale, scale)
        return x, wq, bq, wk, bk, wv, bv

    k1, k2 = jax.random.split(key)
    # nn.Parameter(torch.zeros(1)) -> gamma init is 0; use 0.5 so the residual-scale
    # path is exercised numerically.
    gamma = 0.5

    # Case 1: default interface (f32 attention map), N = 64 (exact tile).
    args1 = make_inputs(k1, 2, 16, 8, 8)
    out1, attn1 = _run_case(*args1, gamma)
    out1_ref, attn1_ref = self_attention_ref(*args1, gamma)
    assert jnp.allclose(out1, out1_ref, atol=3e-2, rtol=3e-2)
    assert jnp.allclose(attn1, attn1_ref, atol=2e-2, rtol=2e-2)
    assert jnp.allclose(jnp.sum(attn1, axis=-1), 1.0, atol=1e-3)   # exact normalization

    # Case 2: bf16 attention-map writeback + token count not a multiple of 8
    #         (exercises the padding/mask path that replaced the monolithic fallback).
    args2 = make_inputs(k2, 1, 16, 5, 5)
    out2, attn2 = _run_case(*args2, gamma, attn_dtype=jnp.bfloat16)
    out2_ref, attn2_ref = self_attention_ref(*args2, gamma)
    assert jnp.allclose(out2, out2_ref, atol=3e-2, rtol=3e-2)
    assert jnp.allclose(attn2.astype(jnp.float32), attn2_ref, atol=2e-2, rtol=2e-2)
    assert jnp.allclose(jnp.sum(attn2.astype(jnp.float32), axis=-1), 1.0, atol=1e-2)

    # Case 3: attention map dropped entirely (removes the roofline HBM writeback).
    out3 = _run_case(*args1, gamma, return_attn=False)
    assert jnp.allclose(out3, out1_ref, atol=3e-2, rtol=3e-2)

    print("KERNEL_OK")
</pallas_src>

<mosaic_0001>
module attributes {stable_mosaic.version = 11 : i64} {
  func.func @_self_attn_kernel(%arg0: i32, %arg1: i32, %arg2: memref<1x1xf32, #tpu.memory_space<smem>>, %arg3: memref<1x64x16xf32, #tpu.memory_space<vmem>>, %arg4: memref<1x2x64xbf16, #tpu.memory_space<vmem>>, %arg5: memref<1x64x16xbf16, #tpu.memory_space<vmem>>, %arg6: memref<16x2xbf16, #tpu.memory_space<vmem>>, %arg7: memref<1x2xf32, #tpu.memory_space<vmem>>, %arg8: memref<1x64x16xf32, #tpu.memory_space<vmem>>, %arg9: memref<1x64x64xf32, #tpu.memory_space<vmem>>) attributes {dimension_semantics = [#tpu.dimension_semantics<parallel>, #tpu.dimension_semantics<parallel>], iteration_bounds = array<i64: 2, 1>, scalar_prefetch = 0 : i64, scratch_operands = 0 : i64, tpu.core_type = #tpu.core_type<tc>, window_params = [{transform_indices = @transform_0, window_bounds = array<i64: 1, 1>}, {transform_indices = @transform_1, window_bounds = array<i64: 1, 64, 16>}, {transform_indices = @transform_2, window_bounds = array<i64: 1, 2, 64>}, {transform_indices = @transform_3, window_bounds = array<i64: 1, 64, 16>}, {pipeline_mode = #tpu.pipeline_mode<synchronous>, transform_indices = @transform_4, window_bounds = array<i64: 16, 2>}, {pipeline_mode = #tpu.pipeline_mode<synchronous>, transform_indices = @transform_5, window_bounds = array<i64: 1, 2>}, {transform_indices = @transform_6, window_bounds = array<i64: 1, 64, 16>}, {transform_indices = @transform_7, window_bounds = array<i64: 1, 64, 64>}]} {
    %c0 = arith.constant 0 : index
    %c0_0 = arith.constant 0 : index
    %c0_1 = arith.constant 0 : index
    %0 = vector.load %arg3[%c0, %c0_0, %c0_1] : memref<1x64x16xf32, #tpu.memory_space<vmem>>, vector<1x64x16xf32>
    %1 = vector.shape_cast %0 : vector<1x64x16xf32> to vector<64x16xf32>
    %2 = arith.truncf %1 : vector<64x16xf32> to vector<64x16xbf16>
    %c0_2 = arith.constant 0 : index
    %c0_3 = arith.constant 0 : index
    %3 = vector.load %arg6[%c0_2, %c0_3] : memref<16x2xbf16, #tpu.memory_space<vmem>>, vector<16x2xbf16>
    %cst = arith.constant dense<0.000000e+00> : vector<64x2xf32>
    %4 = tpu.matmul %2, %3, %cst {dimension_numbers = #tpu.dot_dimension_numbers<[1], [0], [0], [1], [0, 0, 1, 1], [], []>} : vector<64x16xbf16>, vector<16x2xbf16>, vector<64x2xf32> -> vector<64x2xf32>
    %c0_4 = arith.constant 0 : index
    %c0_5 = arith.constant 0 : index
    %5 = vector.load %arg7[%c0_4, %c0_5] : memref<1x2xf32, #tpu.memory_space<vmem>>, vector<1x2xf32>
    %6 = vector.broadcast %5 : vector<1x2xf32> to vector<64x2xf32>
    %7 = arith.addf %4, %6 : vector<64x2xf32>
    %8 = arith.truncf %7 : vector<64x2xf32> to vector<64x2xbf16>
    %c0_6 = arith.constant 0 : index
    %c0_7 = arith.constant 0 : index
    %c0_8 = arith.constant 0 : index
    %9 = vector.load %arg4[%c0_6, %c0_7, %c0_8] : memref<1x2x64xbf16, #tpu.memory_space<vmem>>, vector<1x2x64xbf16>
    %10 = vector.shape_cast %9 : vector<1x2x64xbf16> to vector<2x64xbf16>
    %cst_9 = arith.constant dense<0.000000e+00> : vector<64x64xf32>
    %11 = tpu.matmul %8, %10, %cst_9 {dimension_numbers = #tpu.dot_dimension_numbers<[1], [0], [0], [1], [0, 0, 1, 1], [], []>} : vector<64x2xbf16>, vector<2x64xbf16>, vector<64x64xf32> -> vector<64x64xf32>
    %cst_10 = arith.constant dense<0xFF800000> : vector<64xf32>
    %12 = vector.multi_reduction <maximumf>, %11, %cst_10 [1] : vector<64x64xf32> to vector<64xf32>
    %13 = vector.shape_cast %12 : vector<64xf32> to vector<64x1xf32>
    %14 = vector.broadcast %13 : vector<64x1xf32> to vector<64x64xf32>
    %15 = arith.subf %11, %14 : vector<64x64xf32>
    %16 = math.exp %15 : vector<64x64xf32>
    %cst_11 = arith.constant dense<0.000000e+00> : vector<64xf32>
    %17 = vector.multi_reduction <add>, %16, %cst_11 [1] : vector<64x64xf32> to vector<64xf32>
    %18 = vector.shape_cast %17 : vector<64xf32> to vector<64x1xf32>
    %cst_12 = arith.constant 1.000000e+00 : f32
    %19 = vector.broadcast %cst_12 : f32 to vector<64x1xf32>
    %20 = arith.divf %19, %18 : vector<64x1xf32>
    %21 = arith.truncf %16 : vector<64x64xf32> to vector<64x64xbf16>
    %c0_13 = arith.constant 0 : index
    %c0_14 = arith.constant 0 : index
    %c0_15 = arith.constant 0 : index
    %22 = vector.load %arg5[%c0_13, %c0_14, %c0_15] : memref<1x64x16xbf16, #tpu.memory_space<vmem>>, vector<1x64x16xbf16>
    %23 = vector.shape_cast %22 : vector<1x64x16xbf16> to vector<64x16xbf16>
    %cst_16 = arith.constant dense<0.000000e+00> : vector<64x16xf32>
    %24 = tpu.matmul %21, %23, %cst_16 {dimension_numbers = #tpu.dot_dimension_numbers<[1], [0], [0], [1], [0, 0, 1, 1], [], []>} : vector<64x64xbf16>, vector<64x16xbf16>, vector<64x16xf32> -> vector<64x16xf32>
    %25 = vector.broadcast %20 : vector<64x1xf32> to vector<64x16xf32>
    %26 = arith.mulf %24, %25 : vector<64x16xf32>
    %c0_17 = arith.constant 0 : index
    %c0_18 = arith.constant 0 : index
    %27 = memref.load %arg2[%c0_17, %c0_18] : memref<1x1xf32, #tpu.memory_space<smem>>
    %28 = vector.broadcast %27 : f32 to vector<64x16xf32>
    %29 = arith.mulf %28, %26 : vector<64x16xf32>
    %30 = arith.addf %1, %29 : vector<64x16xf32>
    %c0_19 = arith.constant 0 : index
    %c0_20 = arith.constant 0 : index
    %c0_21 = arith.constant 0 : index
    %31 = vector.load %arg8[%c0_19, %c0_20, %c0_21] : memref<1x64x16xf32, #tpu.memory_space<vmem>>, vector<1x64x16xf32>
    %32 = vector.shape_cast %31 : vector<1x64x16xf32> to vector<64x16xf32>
    %33 = vector.shape_cast %30 : vector<64x16xf32> to vector<1x64x16xf32>
    tpu.vector_store %arg8[%c0_19, %c0_20, %c0_21], %33 {strides = array<i32>} : memref<1x64x16xf32, #tpu.memory_space<vmem>>, vector<1x64x16xf32>,
    %34 = vector.broadcast %20 : vector<64x1xf32> to vector<64x64xf32>
    %35 = arith.mulf %16, %34 : vector<64x64xf32>
    %c0_22 = arith.constant 0 : index
    %c0_23 = arith.constant 0 : index
    %c0_24 = arith.constant 0 : index
    %36 = vector.load %arg9[%c0_22, %c0_23, %c0_24] : memref<1x64x64xf32, #tpu.memory_space<vmem>>, vector<1x64x64xf32>
    %37 = vector.shape_cast %36 : vector<1x64x64xf32> to vector<64x64xf32>
    %38 = vector.shape_cast %35 : vector<64x64xf32> to vector<1x64x64xf32>
    tpu.vector_store %arg9[%c0_22, %c0_23, %c0_24], %38 {strides = array<i32>} : memref<1x64x64xf32, #tpu.memory_space<vmem>>, vector<1x64x64xf32>,
    return
  }
  func.func @transform_0(%arg0: i32, %arg1: i32) -> (i32, i32) {
    %c0_i32 = arith.constant 0 : i32
    %c0_i32_0 = arith.constant 0 : i32
    %c0_i32_1 = arith.constant 0 : i32
    return %c0_i32, %c0_i32_0 : i32, i32
  }
  func.func @transform_1(%arg0: i32, %arg1: i32) -> (i32, i32, i32) {
    %c0_i32 = arith.constant 0 : i32
    %c0_i32_0 = arith.constant 0 : i32
    return %arg0, %arg1, %c0_i32 : i32, i32, i32
  }
  func.func @transform_2(%arg0: i32, %arg1: i32) -> (i32, i32, i32) {
    %c0_i32 = arith.constant 0 : i32
    %c0_i32_0 = arith.constant 0 : i32
    %c0_i32_1 = arith.constant 0 : i32
    return %arg0, %c0_i32, %c0_i32_0 : i32, i32, i32
  }
  func.func @transform_3(%arg0: i32, %arg1: i32) -> (i32, i32, i32) {
    %c0_i32 = arith.constant 0 : i32
    %c0_i32_0 = arith.constant 0 : i32
    %c0_i32_1 = arith.constant 0 : i32
    return %arg0, %c0_i32, %c0_i32_0 : i32, i32, i32
  }
  func.func @transform_4(%arg0: i32, %arg1: i32) -> (i32, i32) {
    %c0_i32 = arith.constant 0 : i32
    %c0_i32_0 = arith.constant 0 : i32
    %c0_i32_1 = arith.constant 0 : i32
    return %c0_i32, %c0_i32_0 : i32, i32
  }
  func.func @transform_5(%arg0: i32, %arg1: i32) -> (i32, i32) {
    %c0_i32 = arith.constant 0 : i32
    %c0_i32_0 = arith.constant 0 : i32
    %c0_i32_1 = arith.constant 0 : i32
    return %c0_i32, %c0_i32_0 : i32, i32
  }
  func.func @transform_6(%arg0: i32, %arg1: i32) -> (i32, i32, i32) {
    %c0_i32 = arith.constant 0 : i32
    %c0_i32_0 = arith.constant 0 : i32
    return %arg0, %arg1, %c0_i32 : i32, i32, i32
  }
  func.func @transform_7(%arg0: i32, %arg1: i32) -> (i32, i32, i32) {
    %c0_i32 = arith.constant 0 : i32
    %c0_i32_0 = arith.constant 0 : i32
    return %arg0, %arg1, %c0_i32 : i32, i32, i32
  }
}

</mosaic_0001>

<bundles_post_ra>
// kernel: self_attention_pallas.1
= control target key start
LH: loop header
LB: loop body
LE: loop exit
PB: predicated region body
PF: predicated region fallthrough
CT: control target
= control target key end

     0   :  { %s2147_s0 = inlined_call_operand.<no memory space> [shape: f32[1,1], index: 0, kind: input, shape index: {}]   ;;  %s2148_s1 = inlined_call_operand.hbm [shape: f32[2,64,16], index: 1, kind: input, shape index: {}]   ;;  %s2149_s2 = inlined_call_operand.hbm [shape: bf16[2,2,64], index: 2, kind: input, shape index: {}]   ;;  %s2150_s3 = inlined_call_operand.hbm [shape: bf16[2,64,16], index: 3, kind: input, shape index: {}]   ;;  %s2151_s4 = inlined_call_operand.hbm [shape: bf16[16,2], index: 4, kind: input, shape index: {}]   ;;  %s2152_s5 = inlined_call_operand.hbm [shape: f32[1,2], index: 5, kind: input, shape index: {}]   ;;  %s2153_s6 = inlined_call_operand.hbm [shape: f32[2,64,16], index: 6, kind: output, shape index: {0}]   ;;  %s2154_s7 = inlined_call_operand.hbm [shape: f32[2,64,64], index: 7, kind: output, shape index: {1}]  }
   0x1   :  { %2172 = sst [smem:[#allocation24_spill]] %s2149_s2 }
   0x2   :  { %2173 = sst [smem:[#allocation25_spill]] %s2151_s4 }
   0x3   :  { %13 = sst [smem:[#allocation2]] %s2147_s0 }
   0x4   :  { %14 = vsyncpa [#allocation4], 0 }
   0x5   :  { %16 = vsyncpa [#allocation4 + $0x1], 0 }
   0x6   :  { %17 = vsyncpa [#allocation7], 0 }
   0x7   :  { %19 = vsyncpa [#allocation7 + $0x1], 0 }
   0x8   :  { %20 = vsyncpa [#allocation10], 0 }
   0x9   :  { %21 = vsyncpa [#allocation5], 0 }
   0xa   :  { %23 = vsyncpa [#allocation5 + $0x1], 0 }
   0xb   :  { %24 = vsyncpa [#allocation14], 0 }
   0xc   :  { %26 = vsyncpa [#allocation14 + $0x1], 0  ;;  %s1675_s26 = smov 0   ;;  %s1677_s27 = smov 0  }
   0xd   :  { %s1679_s28 = smov 0   ;;  %s1681_s29 = smov 0  }
   0xe   :  { %s1683_s30 = smov 0   ;;  %s1685_s0 = smov 0  }
   0xf LB: > { %2174 = sst [smem:[#allocation20_spill]] %s1605_s28  ;;  %s1706_s8 = sadd.s32 4294967295, %s1617_s0   ;;  %s1617_s0 = sphi %s1685_s0, %s32_s0   ;;  %s1613_s30 = sphi %s1683_s30, %s2210_s30   ;;  %s1609_s29 = sphi %s1681_s29, %s2209_s29   ;;  %s1605_s28 = sphi %s1679_s28, %s2205_s28   ;;  %s1601_s27 = sphi %s1677_s27, %s2208_s27   ;;  %s1597_s26 = sphi %s1675_s26, %s2207_s26  }
  0x10   : > { %2175 = sst [smem:[#allocation21_spill]] %s1617_s0  ;;  %s1096_s9 = sadd.s32 4294967294, %s1617_s0  }
  0x11   : > { %p87_p0 = scmp.ne.s32.totalorder %s1601_s27, %s1597_s26  ;;  %p2155_p1 = scmp.eq.s32.totalorder %s1706_s8, 0 }
  0x12   : > { %p213_p3 = scmp.eq.s32.totalorder %s1096_s9, 1  ;;  %p1097_p5 = scmp.ge.s32.totalorder %s1617_s0, 1 }
  0x13   : > { %p1715_p4 = por %p2155_p1, %p87_p0  ;;  %p248_p7 = scmp.lt.s32.totalorder %s1617_s0, 3 }
  0x14   : > { %p1720_p6 = por %p213_p3, %p87_p0  ;;  %s1619_s13 = smov [#allocation9]  }
  0x15   : > { %s2176_s10 = scalar_select %p1715_p4, 1, 0 }
  0x16   : > { %s2177_s11 = scalar_select %p1720_p6, 1, 0 }
  0x17   : > { %p1725_p8 = pnand %p1097_p5, %p248_p7  ;;  %s263_s14 = sshll.u32 %s1619_s13, 4  ;;  %s264_s14 = int_to_ptr.vmem [resolvable:$true] %s263_s14 }
  0x18   : > { %s44_s16 = sadd.s32 1, %s1613_s30  ;;  %s2180_s4 = sld [smem:[#allocation25_spill]] }
  0x19   : > { %s2178_s12 = scalar_select %p1725_p8, 1, 0 }
  0x1a   : > { %p1226_p9 = pneg %p1725_p8 }
  0x1c   : > { %p1734_p11 = pnand %p1226_p9, %p2155_p1 }
  0x1e   : > { %s2179_s15 = scalar_select %p1734_p11, 1, 0 }
  0x1f   : > { %s1349_s19 = scalar_lea.hbm %s2180_s4, 128  ;;  %p2163_p13 = pneg %p1734_p11 }
  0x20   : > { %p1350_p12 = scmp.ne.s32.totalorder %s2180_s4, %s1349_s19  ;;  %p1356_p5 = scmp.lt.u32.totalorder %s1349_s19, %s2180_s4 }
  0x22   : > { %p1352_p0 = pnand %p2163_p13, %p1350_p12 }
  0x24   : > { %p1353_p3 = pneg %p1352_p0 }
  0x26   : > { %p1358_p7 = pnand %p1356_p5, %p1353_p3 }
  0x28   : > { %1361 = shalt.err (!%p1358_p7)
}
  0x29   : > { %s1362_s24 = scalar_lea.vmem %s264_s14, 128  ;;  %p1370_p2 = scmp.lt.s32.totalorder %s264_s14, %s264_s14 }
  0x2a   : > { %p1363_p9 = scmp.ne.s32.totalorder %s264_s14, %s1362_s24  ;;  %p1371_p6 = scmp.lt.s32.totalorder %s1362_s24, %s1362_s24 }
  0x2c   : > { %p1365_p10 = pnand %p1363_p9, %p2163_p13  ;;  %p1372_p4 = por %p1371_p6, %p1370_p2 }
  0x2e   : > { %p1366_p1 = pneg %p1365_p10 }
  0x30   : > { %p1373_p8 = pnand %p1372_p4, %p1366_p1 }
  0x32   : > { %1376 = shalt.err (!%p1373_p8)
}
  0x33   : > { %s2158_s25 = smov 64   ;;  %s2159_s9 = smov 4  }
  0x34   : > { %1229 = dma.hbm_to_vmem [thread:$0]  (!%p1734_p11), %s2180_s4, 128, %s264_s14, [#allocation10], %s2158_s25, %s2158_s25, %s2159_s9  }
  0x35   : > { %p46_p1 = scmp.ge.s32.totalorder %s44_s16, 2  ;;  %s74_s18 = sadd.s32 1, %s1605_s28 }
  0x36   : > { %p81_p2 = scmp.ne.s32.totalorder %s1605_s28, %s1601_s27  ;;  %p82_p4 = scmp.eq.s32.totalorder %s1617_s0, 0 }
  0x37   : > { %s2212_s16 = smov (%p46_p1, %s44_s16), 0  ;;  %p2182_p8 = scmp.eq.s32.totalorder %s1706_s8, 1 }
  0x38   : > { %2181 = sst [smem:[#allocation22_spill]] %s2212_s16  ;;  %p83_p6 = por %p82_p4, %p81_p2 }
  0x39   : > { %p1772_p10 = por %p2182_p8, %p81_p2  ;;  %s69_s20 = ssub.s32 %s1613_s30, %s2212_s16 }
  0x3a   : > { %p1252_p12 = scmp.lt.s32.totalorder %s1617_s0, 2  ;;  %p72_p0 = scmp.eq.s32.totalorder %s69_s20, 0 }
  0x3b   : > { %s2183_s19 = scalar_select %p1772_p10, 1, 0 }
  0x3c   : > { %s1780_s21 = sand.u32 1, %s1605_s28   ;;  %p1782_p3 = pnand %p1252_p12, %p83_p6 }
  0x3d   : > { %s311_s22 = sand.u32 1, %s1617_s0   ;;  %s1104_s24 = sshll.u32 %s1613_s30, 4 }
  0x3e   : > { %s2184_s14 = scalar_select %p1782_p3, 1, 0 }
  0x3f   : > { %s1788_s23 = scalar_select %p72_p0, %s1605_s28, %s74_s18  }
  0x40   : > { %s2186_s2 = sld [smem:[#allocation24_spill]]  ;;  %s314_s20 = scalar_lea.vmem [#allocation6], %s1780_s21 }
  0x41   : > { %2185 = sst [smem:[#allocation23_spill]] %s1788_s23  ;;  %s321_s9 = sshll.u32 %s314_s20, 4  ;;  %s1797_s9 = int_to_ptr.vmem [resolvable:$true] %s321_s9 }
  0x42   : > { %s1800_s16 = scalar_lea.sflag [#allocation7], %s311_s22  ;;  %p1806_p7 = pneg %p1782_p3 }
  0x44   : > { %s2187_s18 = scalar_select %p1806_p7, 1, 0 }
  0x46   : > { %s1794_s25 = scalar_lea.hbm %s2186_s2, %s1104_s24  ;;  %s1382_s17 = scalar_lea.hbm %s2186_s2, 32 }
  0x47   : > { %s1377_s0 = scalar_lea.hbm %s1794_s25, 16  ;;  %p1383_p2 = scmp.lt.u32.totalorder %s1794_s25, %s2186_s2 }
  0x48   : > { %p1378_p5 = scmp.ne.s32.totalorder %s1794_s25, %s1377_s0  ;;  %p1384_p4 = scmp.lt.u32.totalorder %s1382_s17, %s1377_s0 }
  0x49   : > { %p1386_p8 = scmp.lt.u32.totalorder %s1377_s0, %s1794_s25 }
  0x4a   : > { %p1380_p9 = pnand %p1806_p7, %p1378_p5  ;;  %p1385_p6 = por %p1384_p4, %p1383_p2 }
  0x4c   : > { %p1381_p1 = pneg %p1380_p9  ;;  %p1387_p12 = por %p1386_p8, %p1385_p6 }
  0x4e   : > { %p1388_p0 = pnand %p1387_p12, %p1381_p1 }
  0x50   : > { %1391 = shalt.err (!%p1388_p0)
}
  0x51   : > { %s1392_s22 = scalar_lea.vmem %s1797_s9, 16  ;;  %s1622_s24 = smov [#allocation6]  }
  0x52   : > { %p1393_p5 = scmp.ne.s32.totalorder %s1797_s9, %s1392_s22  ;;  %s1397_s13 = sshll.u32 %s1622_s24, 4  ;;  %s1398_s13 = int_to_ptr.vmem [resolvable:$false] %s1397_s13 }
  0x53   : > { %s1399_s23 = scalar_lea.vmem %s1398_s13, 32  ;;  %p1400_p10 = scmp.lt.s32.totalorder %s1797_s9, %s1398_s13 }
  0x54   : > { %p1395_p9 = pnand %p1393_p5, %p1806_p7  ;;  %p1401_p11 = scmp.lt.s32.totalorder %s1399_s23, %s1392_s22 }
  0x56   : > { %p1396_p13 = pneg %p1395_p9  ;;  %p1402_p2 = por %p1401_p11, %p1400_p10 }
  0x58   : > { %p1403_p4 = pnand %p1402_p2, %p1396_p13 }
  0x5a   : > { %1406 = shalt.err (!%p1403_p4)
}
  0x5b   : > { %1239 = dma.hbm_to_vmem [thread:$0]  (!%p1782_p3), %s1794_s25, 16, %s1797_s9, %s1800_s16  }
  0x5c   : > { %s1623_s0 = smov [#allocation11]   ;;  %s1101_s20 = sshll.u32 %s1780_s21, 6 }
  0x5d   : > { %s277_s17 = sshll.u32 %s1623_s0, 4  ;;  %s1407_s13 = scalar_lea.hbm %s2152_s5, 16  ;;  %s278_s17 = int_to_ptr.vmem [resolvable:$true] %s277_s17 }
  0x5e   : > { %p1408_p11 = scmp.ne.s32.totalorder %s2152_s5, %s1407_s13  ;;  %p2188_p13 = scmp.ne.s32.totalorder %s2179_s15, 0 }
  0x5f   : > { %p1414_p8 = scmp.lt.u32.totalorder %s1407_s13, %s2152_s5 }
  0x60   : > { %p2189_p10 = pneg %p2188_p13 }
  0x62   : > { %p1410_p1 = pnand %p1408_p11, %p2189_p10 }
  0x64   : > { %p1411_p6 = pneg %p1410_p1 }
  0x66   : > { %p1416_p12 = pnand %p1414_p8, %p1411_p6 }
  0x68   : > { %1419 = shalt.err (!%p1416_p12)
}
  0x69   : > { %s1420_s25 = scalar_lea.vmem %s278_s17, 16  ;;  %p2190_p5 = pmov %p2189_p10 }
  0x6a   : > { %p1421_p0 = scmp.ne.s32.totalorder %s278_s17, %s1420_s25  ;;  %s1427_s4 = scalar_lea.vmem %s278_s17, 32 }
  0x6b   : > { %p1428_p4 = scmp.lt.s32.totalorder %s278_s17, %s278_s17  ;;  %p1429_p3 = scmp.lt.s32.totalorder %s1427_s4, %s1420_s25 }
  0x6c   : > { %p1423_p9 = pnand %p1421_p0, %p2190_p5 }
  0x6d   : > { %p1430_p7 = por %p1429_p3, %p1428_p4 }
  0x6e   : > { %p1424_p2 = pneg %p1423_p9 }
  0x70   : > { %p1431_p10 = pnand %p1430_p7, %p1424_p2 }
  0x72   : > { %1434 = shalt.err (!%p1431_p10)
}
  0x73   : > { %1232 = dma.hbm_to_vmem [thread:$0]  (!%p2188_p13), %s2152_s5, 16, %s278_s17, [#allocation10]  }
  0x74   : > { %s1141_s28 = sshll.u32 %s1613_s30, 10  ;;  %s292_s0 = scalar_lea.vmem [#allocation3], %s1101_s20 }
  0x75   : > { %s301_s24 = sshll.u32 %s292_s0, 4  ;;  %s1855_s23 = scalar_lea.hbm %s2148_s1, %s1141_s28  ;;  %s1857_s24 = int_to_ptr.vmem [resolvable:$true] %s301_s24 }
  0x76   : > { %s289_s15 = scalar_lea.sflag [#allocation4], %s1780_s21  ;;  %s1435_s25 = scalar_lea.hbm %s1855_s23, 1024 }
  0x77   : > { %p1436_p3 = scmp.ne.s32.totalorder %s1855_s23, %s1435_s25  ;;  %p2191_p7 = scmp.ne.s32.totalorder %s2187_s18, 0 }
  0x78   : > { %s1440_s4 = scalar_lea.hbm %s2148_s1, 2048  ;;  %p1441_p1 = scmp.lt.u32.totalorder %s1855_s23, %s2148_s1 }
  0x79   : > { %p1438_p11 = pnand %p1436_p3, %p2191_p7  ;;  %p1442_p6 = scmp.lt.u32.totalorder %s1440_s4, %s1435_s25 }
  0x7a   : > { %p1444_p12 = scmp.lt.u32.totalorder %s1435_s25, %s1855_s23 }
  0x7b   : > { %p1439_p13 = pneg %p1438_p11  ;;  %p1443_p8 = por %p1442_p6, %p1441_p1 }
  0x7d   : > { %p1445_p0 = por %p1444_p12, %p1443_p8 }
  0x7f   : > { %p1446_p5 = pnand %p1445_p0, %p1439_p13 }
  0x81   : > { %1449 = shalt.err (!%p1446_p5)
}
  0x82   : > { %s1450_s28 = scalar_lea.vmem %s1857_s24, 1024  ;;  %s1624_s0 = smov [#allocation3]  }
  0x83   : > { %p1451_p9 = scmp.ne.s32.totalorder %s1857_s24, %s1450_s28  ;;  %s1455_s13 = sshll.u32 %s1624_s0, 4  ;;  %s1456_s13 = int_to_ptr.vmem [resolvable:$false] %s1455_s13 }
  0x84   : > { %s1457_s22 = scalar_lea.vmem %s1456_s13, 2048  ;;  %p1458_p10 = scmp.lt.s32.totalorder %s1857_s24, %s1456_s13 }
  0x85   : > { %p1453_p2 = pnand %p1451_p9, %p2191_p7  ;;  %p1459_p3 = scmp.lt.s32.totalorder %s1457_s22, %s1450_s28 }
  0x87   : > { %p1454_p4 = pneg %p1453_p2  ;;  %p1460_p11 = por %p1459_p3, %p1458_p10 }
  0x89   : > { %p1461_p1 = pnand %p1460_p11, %p1454_p4 }
  0x8b   : > { %1464 = shalt.err (!%p1461_p1)
}
  0x8c   : > { %s1625_s25 = smov 128   ;;  %s1626_s17 = smov 8  }
  0x8d   : > { %p2192_p13 = scmp.ne.s32.totalorder %s2184_s14, 0  ;;  %s1142_s20 = sshll.u32 %s1613_s30, 9 }
  0x8e   : > { %s1887_s2 = scalar_lea.hbm %s2150_s3, %s1142_s20  ;;  %s2193_s28 = sshll.u32 %s1780_s21, 5 }
  0x8f   : > { %1236 = dma.hbm_to_vmem [thread:$0]  (!%p2192_p13), %s1855_s23, 1024, %s1857_s24, %s289_s15, %s1625_s25, %s1625_s25, %s1626_s17  }
  0x90   : > { %s332_s0 = scalar_lea.vmem [#allocation8], %s2193_s28  ;;  %s1465_s22 = scalar_lea.hbm %s1887_s2, 512 }
  0x91   : > { %s339_s13 = sshll.u32 %s332_s0, 4  ;;  %p1466_p6 = scmp.ne.s32.totalorder %s1887_s2, %s1465_s22  ;;  %s1891_s13 = int_to_ptr.vmem [resolvable:$true] %s339_s13 }
  0x92   : > { %s1470_s15 = scalar_lea.hbm %s2150_s3, 1024  ;;  %p1471_p0 = scmp.lt.u32.totalorder %s1887_s2, %s2150_s3 }
  0x93   : > { %p1468_p8 = pnand %p1466_p6, %p2191_p7  ;;  %p1472_p5 = scmp.lt.u32.totalorder %s1470_s15, %s1465_s22 }
  0x94   : > { %p1474_p2 = scmp.lt.u32.totalorder %s1465_s22, %s1887_s2 }
  0x95   : > { %p1469_p12 = pneg %p1468_p8  ;;  %p1473_p9 = por %p1472_p5, %p1471_p0 }
  0x97   : > { %p1475_p4 = por %p1474_p2, %p1473_p9 }
  0x99   : > { %p1476_p10 = pnand %p1475_p4, %p1469_p12 }
  0x9b   : > { %1479 = shalt.err (!%p1476_p10)
}
  0x9c   : > { %s1480_s21 = scalar_lea.vmem %s1891_s13, 512  ;;  %s1627_s20 = smov [#allocation8]  }
  0x9d   : > { %p1481_p3 = scmp.ne.s32.totalorder %s1891_s13, %s1480_s21  ;;  %s1485_s4 = sshll.u32 %s1627_s20, 4  ;;  %s1486_s4 = int_to_ptr.vmem [resolvable:$false] %s1485_s4 }
  0x9e   : > { %s1487_s9 = scalar_lea.vmem %s1486_s4, 1024  ;;  %p1488_p6 = scmp.lt.s32.totalorder %s1891_s13, %s1486_s4 }
  0x9f   : > { %p1483_p11 = pnand %p1481_p3, %p2191_p7  ;;  %p1489_p8 = scmp.lt.s32.totalorder %s1487_s9, %s1480_s21 }
  0xa1   : > { %p1484_p1 = pneg %p1483_p11  ;;  %p1490_p0 = por %p1489_p8, %p1488_p6 }
  0xa3   : > { %p1491_p5 = pnand %p1490_p0, %p1484_p1 }
  0xa5   : > { %1494 = shalt.err (!%p1491_p5)
}
  0xa6   : > { %s2194_s28 = smov 4   ;;  %s2195_s0 = smov 64  }
  0xa7   : > { %1242 = dma.hbm_to_vmem [thread:$0]  (!%p2192_p13), %s1887_s2, 512, %s1891_s13, %s1800_s16, %s2195_s0, %s2195_s0, %s2194_s28  }
  0xa8   : > { %p2196_p7 = scmp.ne.s32.totalorder %s2178_s12, 0 }
  0xa9   : > { %s1921_s18 = sand.u32 (!%p2196_p7), 1, %s1601_s27   ;;  %p2197_p12 = scmp.ne.s32.totalorder (!%p2196_p7), %s2176_s10, 0 }
  0xaa   : > { %351 = sbr.rel (%p2196_p7) target bundleno = 1033 (0x409), region = 44  ;;  %s1924_s22 = sshll.u32 (!%p2196_p7), %s1921_s18, 6 }
  0xab   : > { %s354_s14 = scalar_lea.sflag (!%p2196_p7), [#allocation4], %s1921_s18  ;;  %s357_s24 = scalar_lea.vmem (!%p2196_p7), [#allocation3], %s1924_s22 }
  0xb1   : > { %1576 = dma.done.wait (%p2197_p12), %s354_s14, 1024  }
  0xb2   : > { %1578 = vsyncadd (%p2197_p12), %s354_s14, 4294966272  ;;  %s362_s12 = sand.u32 1, %s1706_s8   ;;  %s365_s2 = scalar_lea.vmem [#allocation6], %s1921_s18 }
  0xb3   : > { %s363_s16 = scalar_lea.sflag [#allocation7], %s362_s12 }
  0xb4   : > { %1580 = dma.done.wait (%p2197_p12), %s363_s16, 528  }
  0xb5   : > { %1582 = vsyncadd (%p2197_p12), %s363_s16, 4294966768  ;;  %s1110_s13 = sshll.u32 %s1921_s18, 5  ;;  %p2198_p13 = scmp.eq.s32.totalorder %s1706_s8, 0 }
  0xb6   : > { %s1939_s23 = scalar_lea.vmem [#allocation8], %s1110_s13 }
  0xb7   : > { %1584 = dma.done.wait (%p2198_p13), [#allocation10], 144   ;;  %p2199_p9 = pmov %p2198_p13 }
  0xb8   : > { %v1312_v0 = vld [vmem:[#allocation9] sm:$0xff]   ;;  %vm458_vm0 = vcmask 130048   ;;  %v1949_v3 = vld [vmem:[%s357_s24 + $0x10] sm:$0xff]  ;;  %v1953_v5 = vld [vmem:[%s357_s24 + $0x18] sm:$0xff]  ;;  %vm554_vm1 = vcmask 1040384   ;;  %vm541_vm2 = vcmask 15360  }
  0xb9   : > { %1586 = vsyncadd (%p2199_p9), [#allocation10], 4294967152  ;;  %v1945_v1 = vld [vmem:[%s357_s24] sm:$0xff]  ;;  %v1947_v2 = vld [vmem:[%s357_s24 + $0x8] sm:$0xff]  ;;  %1163 = vmatprep.subr.bf16.mxu0 %v1312_v0  ;;  %v440_v8 = vpack.c.bf16 %v1953_v5, %v1949_v3  ;;  %vm623_vm3 = vcmask 523264   ;;  %s426_s8 = scalar_lea.vmem [#allocation13], %s1924_s22 }
  0xba   : > { %v439_v4 = vpack.c.bf16 %v1947_v2, %v1945_v1  ;;  %v1955_v6 = vld [vmem:[%s357_s24 + $0x20] sm:$0xff]  ;;  %v1957_v7 = vld [vmem:[%s357_s24 + $0x28] sm:$0xff]  ;;  %1164 = vmatpush3.bf16.msra.mxu0 %v1312_v0  ;;  %v1966_v10 = vld [vmem:[%s357_s24 + $0x30] sm:$0xff]  ;;  %s1143_s10 = sshll.u32 %s1609_s29, 10  ;;  %s914_s15 = sshll.u32 %s426_s8, 4  ;;  %s2035_s15 = int_to_ptr.vmem [resolvable:$true] %s914_s15 }
  0xbb   : > { %v441_v9 = vpack.c.bf16 %v1957_v7, %v1955_v6  ;;  %v1968_v11 = vld [vmem:[%s357_s24 + $0x38] sm:$0xff]  ;;  %v540_v13 = vld [vmem:[%s365_s2] sm:$0x1]  ;;  %v1115_v16 = vld [vmem:[#allocation11] ss:$0 sm:$0xff]  ;;  %s2033_s21 = scalar_lea.hbm %s2154_s7, %s1143_s10  ;;  %s881_s20 = scalar_lea.sflag [#allocation14], %s1921_s18 }
  0xbc   : > { %1165 = vmatprep.mubr.msk.bf16.mxu0 %vm458_vm0, %v439_v4  ;;  %v442_v12 = vpack.c.bf16 %v1968_v11, %v1966_v10  ;;  %1207 = vmatprep.subr.msk.bf16.mxu1 %vm554_vm1, %v540_v13  ;;  %v556_v14 = vsel %vm554_vm1, %v540_v13, 0  ;;  %v1313_v52 = vld [vmem:[%s1939_s23] sm:$0xff]   ;;  %v1314_v53 = vld [vmem:[%s1939_s23 + $0x8] sm:$0xff]   ;;  %v1315_v54 = vld [vmem:[%s1939_s23 + $0x10] sm:$0xff]   ;;  %s1495_s4 = scalar_lea.vmem %s2035_s15, 1024  ;;  %p2200_p4 = scmp.ne.s32.totalorder %s2183_s19, 0 }
  0xbd   : > { %1166 = vmatmul.mubr.msk.bf16.vlgmr.msra.gmra.mrb[0].mxu0 %vm458_vm0, %v440_v8  ;;  %1174 = vmatpush3.bf16.msra.mxu1 %v556_v14  ;;  %v1316_v55 = vld [vmem:[%s1939_s23 + $0x18] sm:$0xff]   ;;  %p1496_p2 = scmp.ne.s32.totalorder %s2035_s15, %s1495_s4  ;;  %s1628_s9 = smov [#allocation13]  }
  0xbe   : > { %1169 = vmatprep.mubr.msk.bf16.mxu0 %vm458_vm0, %v441_v9  ;;  %1183 = vmatprep.subr.bf16.mxu0 %v1313_v52  ;;  %s1499_s28 = sshll.u32 %s1628_s9, 4  ;;  %s1500_s28 = int_to_ptr.vmem [resolvable:$false] %s1499_s28 }
  0xbf   : > { %1199 = vmatprep.subr.bf16.mxu1 %v1313_v52  ;;  %1184 = vmatpush3.bf16.msra.mxu0 %v1313_v52  ;;  %p1497_p10 = pnand %p1496_p2, %p2200_p4  ;;  %s1501_s0 = scalar_lea.vmem %s1500_s28, 2048 }
  0xc0   : > { %1185 = vmatprep.subr.bf16.mxu0 %v1314_v53  ;;  %p1502_p11 = scmp.lt.s32.totalorder %s2035_s15, %s1500_s28  ;;  %p1503_p1 = scmp.lt.s32.totalorder %s1501_s0, %s1495_s4 }
  0xc1   : > { %p1498_p3 = pneg %p1497_p10 }
  0xc2   : > { %p1504_p6 = por %p1503_p1, %p1502_p11 }
  0xc3   : > { %1186 = vmatpush3.bf16.msra.mxu0 %v1314_v53 }
  0xc4   : > { %1187 = vmatprep.subr.bf16.mxu0 %v1315_v54  ;;  %p1505_p8 = pnand %p1504_p6, %p1498_p3 }
  0xc5   : > { %1170 = vmatmul.mubr.msk.bf16.gmra.mrb[4].mxu0 %vm458_vm0, %v442_v12 }
  0xc7   : > { %1188 = vmatpush3.bf16.msra.mxu0 %v1315_v54 }
  0xc8   : > { %1189 = vmatprep.subr.bf16.mxu0 %v1316_v55 }
  0xcb   : > { %1190 = vmatpush3.bf16.msra.mxu0 %v1316_v55 }
 0x190   : > { %v1167_v15 = vpop.f32.mrb[0].mxu0 }
 0x191   : > { %v505_v17 = vpop.f32.mrb[1].mxu0  ;;  %v514_v19 = vadd.f32 %v1167_v15, %v1115_v16 }
 0x192   : > { %v1168_v18 = vpop.f32.mrb[2].mxu0  ;;  %v506_v22 = vadd.f32 %v1115_v16, %v505_v17 }
 0x193   : > { %v517_v20 = vadd.f32 %v1168_v18, %v1115_v16  ;;  %v508_v21 = vpop.f32.mrb[3].mxu0 }
 0x194   : > { %v509_v23 = vadd.f32 %v1115_v16, %v508_v21 }
 0x195   : > { %v537_v24 = vpack.c.bf16 %v517_v20, %v514_v19 }
 0x196   : > { %v536_v25 = vpack.c.bf16 %v509_v23, %v506_v22 }
 0x198   : > { %v1171_v26 = vpop.f32.mrb[4].mxu0  ;;  %1175 = vmatprep.mubr.msk.bf16.mxu1 %vm541_vm2, %v536_v25 }
 0x199   : > { %v521_v27 = vpop.f32.mrb[5].mxu0  ;;  %1176 = vmatmul.mubr.msk.bf16.vlgmr.msra.gmra.mrb[0].mxu1 %vm541_vm2, %v537_v24  ;;  %v530_v29 = vadd.f32 %v1171_v26, %v1115_v16 }
 0x19a   : > { %v1172_v28 = vpop.f32.mrb[6].mxu0  ;;  %v522_v32 = vadd.f32 %v1115_v16, %v521_v27  ;;  %1203 = vmatpush3.bf16.msra.mxu1 %v1313_v52 }
 0x19b   : > { %v533_v30 = vadd.f32 %v1172_v28, %v1115_v16  ;;  %v524_v31 = vpop.f32.mrb[7].mxu0  ;;  %1200 = vmatprep.subr.bf16.mxu1 %v1314_v53 }
 0x19c   : > { %v525_v33 = vadd.f32 %v1115_v16, %v524_v31 }
 0x19d   : > { %v539_v34 = vpack.c.bf16 %v533_v30, %v530_v29 }
 0x19e   : > { %v538_v35 = vpack.c.bf16 %v525_v33, %v522_v32  ;;  %1204 = vmatpush3.bf16.msra.mxu1 %v1314_v53 }
 0x19f   : > { %1201 = vmatprep.subr.bf16.mxu1 %v1315_v54 }
 0x1a0   : > { %1179 = vmatprep.mubr.msk.bf16.mxu1 %vm541_vm2, %v538_v35 }
 0x1a1   : > { %1180 = vmatmul.mubr.msk.bf16.gmra.mrb[4].mxu1 %vm541_vm2, %v539_v34 }
 0x1a2   : > { %1205 = vmatpush3.bf16.msra.mxu1 %v1315_v54 }
 0x1a3   : > { %1202 = vmatprep.subr.bf16.mxu1 %v1316_v55 }
 0x1a6   : > { %1206 = vmatpush3.bf16.msra.mxu1 %v1316_v55 }
 0x26c   : > { %v1177_v36 = vpop.f32.mrb[0].mxu1 }
 0x26d   : > { %v592_v37 = vpop.f32.mrb[1].mxu1  ;;  %v630_v38 = vsel %vm623_vm3, %v1177_v36, -inf }
 0x26e   : > { %631 = vmax.xlane.f32.xlu0 %v630_v38  ;;  %v1178_v39 = vpop.f32.mrb[2].mxu1  ;;  %v624_v42 = vsel %vm623_vm3, %v592_v37, -inf }
 0x26f   : > { %v595_v40 = vpop.f32.mrb[3].mxu1  ;;  %v633_v41 = vsel %vm623_vm3, %v1178_v39, -inf }
 0x270   : > { %634 = vmax.xlane.f32.xlu1 %v633_v41  ;;  %v627_v45 = vsel %vm623_vm3, %v595_v40, -inf }
 0x272   : > { %625 = vmax.xlane.f32.xlu0 %v624_v42 }
 0x274   : > { %v1181_v43 = vpop.f32.mrb[4].mxu1 }
 0x275   : > { %v608_v44 = vpop.f32.mrb[5].mxu1  ;;  %v642_v49 = vsel %vm623_vm3, %v1181_v43, -inf }
 0x276   : > { %628 = vmax.xlane.f32.xlu0 %v627_v45  ;;  %v1977_v46 = vpop.f32.mrb[6].mxu1  ;;  %v636_v47 = vsel %vm623_vm3, %v608_v44, -inf }
 0x277   : > { %637 = vmax.xlane.f32.xlu1 %v636_v47  ;;  %v611_v48 = vpop.f32.mrb[7].mxu1  ;;  %v645_v51 = vsel %vm623_vm3, %v1977_v46, -inf }
 0x278   : > { %v639_v50 = vsel %vm623_vm3, %v611_v48, -inf }
 0x27a   : > { %643 = vmax.xlane.f32.xlu0 %v642_v49 }
 0x27b   : > { %640 = vmax.xlane.f32.xlu1 %v639_v50 }
 0x27f   : > { %646 = vmax.xlane.f32.xlu1 %v645_v51 }
 0x2fb   : > { %v632_v56 = vpop.xlane.xlu0 %631 }
 0x2fc   : > { %v650_v57 = vsub.f32 %v1177_v36, %v632_v56 }
 0x2fd   : > { %v635_v58 = vpop.xlane.xlu1 %634 }
 0x2fe   : > { %v660_v59 = vmul.f32 1.442695, %v650_v57  ;;  %v651_v60 = vsub.f32 %v1178_v39, %v635_v58 }
 0x2ff   : > { %v626_v61 = vpop.xlane.xlu0 %625 }
 0x300   : > { %1317 = vpow2.f32 %v660_v59  ;;  %v662_v62 = vmul.f32 1.442695, %v651_v60  ;;  %v648_v63 = vsub.f32 %v592_v37, %v626_v61 }
 0x302   : > { %1319 = vpow2.f32 %v662_v62  ;;  %v656_v0 = vmul.f32 1.442695, %v648_v63 }
 0x303   : > { %v629_v4 = vpop.xlane.xlu0 %628 }
 0x304   : > { %1321 = vpow2.f32 %v656_v0  ;;  %v649_v8 = vsub.f32 %v595_v40, %v629_v4  ;;  %v638_v9 = vpop.xlane.xlu1 %637 }
 0x305   : > { %v652_v12 = vsub.f32 %v608_v44, %v638_v9 }
 0x306   : > { %v658_v13 = vmul.f32 1.442695, %v649_v8 }
 0x307   : > { %v664_v14 = vmul.f32 1.442695, %v652_v12  ;;  %v644_v15 = vpop.xlane.xlu0 %643 }
 0x308   : > { %1323 = vpow2.f32 %v658_v13  ;;  %v654_v16 = vsub.f32 %v1181_v43, %v644_v15  ;;  %v641_v17 = vpop.xlane.xlu1 %640 }
 0x309   : > { %1325 = vpow2.f32 %v664_v14  ;;  %v653_v18 = vsub.f32 %v611_v48, %v641_v17 }
 0x30a   : > { %v1318_v19 = vpop.eup %1317  ;;  %v668_v20 = vmul.f32 1.442695, %v654_v16 }
 0x30b   : > { %v666_v21 = vmul.f32 1.442695, %v653_v18  ;;  %v678_v22 = vsel %vm623_vm3, %v1318_v19, 0.0 }
 0x30c   : > { %v1320_v23 = vpop.eup %1319  ;;  %1327 = vpow2.f32 %v668_v20  ;;  %679 = vadd.xlane.f32.xlu0 %v678_v22  ;;  %v647_v24 = vpop.xlane.xlu1 %646 }
 0x30d   : > { %1329 = vpow2.f32 %v666_v21  ;;  %v655_v25 = vsub.f32 %v1977_v46, %v647_v24  ;;  %v681_v26 = vsel %vm623_vm3, %v1320_v23, 0.0  ;;  %v713_v35 = vpack.c.bf16 %v1320_v23, %v1318_v19 }
 0x30e   : > { %v1322_v27 = vpop.eup %1321  ;;  %682 = vadd.xlane.f32.xlu1 %v681_v26 }
 0x30f   : > { %v670_v28 = vmul.f32 1.442695, %v655_v25  ;;  %v672_v29 = vsel %vm623_vm3, %v1322_v27, 0.0 }
 0x310   : > { %673 = vadd.xlane.f32.xlu0 %v672_v29 }
 0x311   : > { %1331 = vpow2.f32 %v670_v28 }
 0x312   : > { %v1324_v30 = vpop.eup %1323 }
 0x313   : > { %v1326_v31 = vpop.eup %1325  ;;  %v675_v32 = vsel %vm623_vm3, %v1324_v30, 0.0  ;;  %v712_v33 = vpack.c.bf16 %v1324_v30, %v1322_v27 }
 0x314   : > { %676 = vadd.xlane.f32.xlu1 %v675_v32  ;;  %v684_v34 = vsel %vm623_vm3, %v1326_v31, 0.0 }
 0x315   : > { %1191 = vmatprep.mubr.msk.bf16.mxu0 %vm623_vm3, %v712_v33  ;;  %685 = vadd.xlane.f32.xlu0 %v684_v34 }
 0x316   : > { %v1328_v36 = vpop.eup %1327  ;;  %1192 = vmatmul.mubr.msk.bf16.vlgmr.msra.gmra.mrb[8].mxu0 %vm623_vm3, %v713_v35 }
 0x317   : > { %v1330_v37 = vpop.eup %1329  ;;  %v690_v38 = vsel %vm623_vm3, %v1328_v36, 0.0 }
 0x318   : > { %v687_v39 = vsel %vm623_vm3, %v1330_v37, 0.0  ;;  %v714_v40 = vpack.c.bf16 %v1330_v37, %v1326_v31 }
 0x319   : > { %691 = vadd.xlane.f32.xlu0 %v690_v38  ;;  %688 = vadd.xlane.f32.xlu1 %v687_v39 }
 0x31a   : > { %1195 = vmatprep.mubr.msk.bf16.mxu1 %vm623_vm3, %v714_v40 }
 0x31b   : > { %v1332_v41 = vpop.eup %1331 }
 0x31c   : > { %v693_v42 = vsel %vm623_vm3, %v1332_v41, 0.0  ;;  %v715_v43 = vpack.c.bf16 %v1332_v41, %v1328_v36 }
 0x31d   : > { %694 = vadd.xlane.f32.xlu1 %v693_v42 }
 0x31e   : > { %1196 = vmatmul.mubr.msk.bf16.vlgmr.msra.gmra.mrb[8].mxu1 %vm623_vm3, %v715_v43 }
 0x399   : > { %v680_v44 = vpop.xlane.xlu0 %679 }
 0x39a   : > { %1333 = vrcp.f32 %v680_v44 }
 0x39b   : > { %v683_v45 = vpop.xlane.xlu1 %682 }
 0x39c   : > { %1335 = vrcp.f32 %v683_v45 }
 0x39d   : > { %v674_v46 = vpop.xlane.xlu0 %673 }
 0x39e   : > { %1337 = vrcp.f32 %v674_v46 }
 0x3a1   : > { %v677_v47 = vpop.xlane.xlu1 %676 }
 0x3a2   : > { %1339 = vrcp.f32 %v677_v47  ;;  %v686_v48 = vpop.xlane.xlu0 %685 }
 0x3a3   : > { %1341 = vrcp.f32 %v686_v48 }
 0x3a4   : > { %v2001_v49 = vpop.eup %1333 }
 0x3a5   : > { %v861_v50 = vmul.f32 %v2001_v49, %v1318_v19 }
 0x3a6   : > { %v2004_v51 = vpop.eup %1335  ;;  %v692_v52 = vpop.xlane.xlu0 %691 }
 0x3a7   : > { %v689_v53 = vpop.xlane.xlu1 %688  ;;  %869 = vst.msk [vmem:[%s426_s8 + $0x10] sm:$0xff] %vm623_vm3, %v861_v50  ;;  %v862_v54 = vmul.f32 %v2004_v51, %v1320_v23  ;;  %1343 = vrcp.f32 %v692_v52 }
 0x3a8   : > { %v1338_v55 = vpop.eup %1337  ;;  %1345 = vrcp.f32 %v689_v53 }
 0x3a9   : > { %870 = vst.msk [vmem:[%s426_s8 + $0x18] sm:$0xff] %vm623_vm3, %v862_v54  ;;  %v859_v56 = vmul.f32 %v1338_v55, %v1322_v27 }
 0x3ab   : > { %v695_v57 = vpop.xlane.xlu1 %694  ;;  %867 = vst.msk [vmem:[%s426_s8] sm:$0xff] %vm623_vm3, %v859_v56 }
 0x3ac   : > { %1347 = vrcp.f32 %v695_v57  ;;  %v1340_v58 = vpop.eup %1339 }
 0x3ad   : > { %v2011_v59 = vpop.eup %1341  ;;  %v860_v60 = vmul.f32 %v1340_v58, %v1324_v30 }
 0x3ae   : > { %v863_v61 = vmul.f32 %v2011_v59, %v1326_v31 }
 0x3af   : > { %868 = vst.msk [vmem:[%s426_s8 + $0x8] sm:$0xff] %vm623_vm3, %v860_v60 }
 0x3b0   : > { %871 = vst.msk [vmem:[%s426_s8 + $0x20] sm:$0xff] %vm623_vm3, %v863_v61 }
 0x3b1   : > { %v2016_v62 = vpop.eup %1343 }
 0x3b2   : > { %v2018_v63 = vpop.eup %1345  ;;  %v865_v0 = vmul.f32 %v2016_v62, %v1328_v36 }
 0x3b3   : > { %v864_v4 = vmul.f32 %v2018_v63, %v1330_v37 }
 0x3b4   : > { %873 = vst.msk [vmem:[%s426_s8 + $0x30] sm:$0xff] %vm623_vm3, %v865_v0 }
 0x3b5   : > { %872 = vst.msk [vmem:[%s426_s8 + $0x28] sm:$0xff] %vm623_vm3, %v864_v4 }
 0x3b6   : > { %v2024_v8 = vpop.eup %1347 }
 0x3b7   : > { %v866_v9 = vmul.f32 %v2024_v8, %v1332_v41 }
 0x3b9   : > { %874 = vst.msk [vmem:[%s426_s8 + $0x38] sm:$0xff] %vm623_vm3, %v866_v9 }
 0x3ba   : > { %1508 = shalt.err (!%p1505_p8)
}
 0x3bb   : > { %s1509_s14 = scalar_lea.hbm %s2033_s21, 1024  ;;  %s1513_s16 = scalar_lea.hbm %s2154_s7, 2048 }
 0x3bc   : > { %p1510_p0 = scmp.ne.s32.totalorder %s2033_s21, %s1509_s14  ;;  %p1514_p12 = scmp.lt.u32.totalorder %s2033_s21, %s2154_s7 }
 0x3bd   : > { %p1515_p13 = scmp.lt.u32.totalorder %s1513_s16, %s1509_s14  ;;  %p1517_p2 = scmp.lt.u32.totalorder %s1509_s14, %s2033_s21 }
 0x3be   : > { %p1511_p5 = pnand %p1510_p0, %p2200_p4 }
 0x3bf   : > { %p1516_p9 = por %p1515_p13, %p1514_p12 }
 0x3c0   : > { %p1512_p7 = pneg %p1511_p5 }
 0x3c1   : > { %p1518_p10 = por %p1517_p2, %p1516_p9 }
 0x3c3   : > { %p1519_p3 = pnand %p1518_p10, %p1512_p7 }
 0x3c5   : > { %1522 = shalt.err (!%p1519_p3)
}
 0x3c6   : > { %s1629_s23 = smov 128   ;;  %s1630_s8 = smov 8  }
 0x3c7   : > { %1223 = dma.vmem_to_hbm [thread:$0]  (%p2200_p4), %s2035_s15, 1024, %s2033_s21, %s881_s20, %s1629_s23, %s1629_s23, %s1630_s8  }
 0x3c8   : > { %s833_s25 = sld [smem:[#allocation2]]  ;;  %s419_s15 = scalar_lea.vmem [#allocation12], %s1924_s22 }
 0x3c9   : > { %s896_s22 = sshll.u32 %s419_s15, 4  ;;  %s2091_s20 = scalar_lea.hbm %s2153_s6, %s1143_s10  ;;  %s2093_s22 = int_to_ptr.vmem [resolvable:$true] %s896_s22 }
 0x3ca   : > { %s876_s4 = scalar_lea.sflag [#allocation5], %s1921_s18  ;;  %s1523_s9 = scalar_lea.vmem %s2093_s22, 1024 }
 0x3cb   : > { %p1524_p11 = scmp.ne.s32.totalorder %s2093_s22, %s1523_s9  ;;  %s1631_s29 = smov [#allocation12]  }
 0x3cc   : > { %s1527_s28 = sshll.u32 %s1631_s29, 4  ;;  %s1528_s28 = int_to_ptr.vmem [resolvable:$false] %s1527_s28 }
 0x3cd   : > { %p1525_p1 = pnand %p1524_p11, %p2200_p4  ;;  %s1529_s10 = scalar_lea.vmem %s1528_s28, 2048 }
 0x3ce   : > { %v834_v13 = vstv %s833_s25  ;;  %p1530_p8 = scmp.lt.s32.totalorder %s2093_s22, %s1528_s28  ;;  %p1531_p0 = scmp.lt.s32.totalorder %s1529_s10, %s1523_s9 }
 0x3cf   : > { %p1526_p6 = pneg %p1525_p1 }
 0x3d0   : > { %p1532_p5 = por %p1531_p0, %p1530_p8 }
 0x3d2   : > { %p1533_p7 = pnand %p1532_p5, %p1526_p6 }
 0x3e9   : > { %v1193_v12 = vpop.f32.mrb[8].mxu0 }
 0x3ea   : > { %v827_v14 = vmul.f32 %v2001_v49, %v1193_v12  ;;  %v794_v15 = vpop.f32.mrb[9].mxu0 }
 0x3eb   : > { %v825_v16 = vmul.f32 %v1338_v55, %v794_v15  ;;  %v1194_v17 = vpop.f32.mrb[10].mxu0 }
 0x3ec   : > { %v837_v18 = vmul.f32 %v834_v13, %v827_v14  ;;  %v828_v19 = vmul.f32 %v2004_v51, %v1194_v17  ;;  %v797_v20 = vpop.f32.mrb[11].mxu0 }
 0x3ed   : > { %v835_v21 = vmul.f32 %v834_v13, %v825_v16  ;;  %v826_v22 = vmul.f32 %v1340_v58, %v797_v20 }
 0x3ee   : > { %v845_v23 = vadd.f32 %v837_v18, %v1949_v3  ;;  %v838_v24 = vmul.f32 %v834_v13, %v828_v19 }
 0x3ef   : > { %v843_v25 = vadd.f32 %v835_v21, %v1945_v1  ;;  %v836_v26 = vmul.f32 %v834_v13, %v826_v22 }
 0x3f0   : > { %853 = vst.msk [vmem:[%s419_s15 + $0x10] sm:$0xff] %vm458_vm0, %v845_v23  ;;  %v846_v27 = vadd.f32 %v838_v24, %v1953_v5 }
 0x3f1   : > { %851 = vst.msk [vmem:[%s419_s15] sm:$0xff] %vm458_vm0, %v843_v25  ;;  %v844_v28 = vadd.f32 %v836_v26, %v1947_v2  ;;  %v1197_v29 = vpop.f32.mrb[8].mxu1 }
 0x3f2   : > { %854 = vst.msk [vmem:[%s419_s15 + $0x18] sm:$0xff] %vm458_vm0, %v846_v27  ;;  %v831_v30 = vmul.f32 %v2016_v62, %v1197_v29  ;;  %v810_v31 = vpop.f32.mrb[9].mxu1 }
 0x3f3   : > { %852 = vst.msk [vmem:[%s419_s15 + $0x8] sm:$0xff] %vm458_vm0, %v844_v28  ;;  %v829_v1 = vmul.f32 %v2011_v59, %v810_v31  ;;  %v1198_v3 = vpop.f32.mrb[10].mxu1 }
 0x3f4   : > { %v841_v32 = vmul.f32 %v834_v13, %v831_v30  ;;  %v832_v33 = vmul.f32 %v2024_v8, %v1198_v3  ;;  %v813_v5 = vpop.f32.mrb[11].mxu1 }
 0x3f5   : > { %v839_v34 = vmul.f32 %v834_v13, %v829_v1  ;;  %v830_v2 = vmul.f32 %v2018_v63, %v813_v5 }
 0x3f6   : > { %v849_v35 = vadd.f32 %v841_v32, %v1966_v10  ;;  %v842_v36 = vmul.f32 %v834_v13, %v832_v33 }
 0x3f7   : > { %v847_v37 = vadd.f32 %v839_v34, %v1955_v6  ;;  %v840_v38 = vmul.f32 %v834_v13, %v830_v2 }
 0x3f8   : > { %857 = vst.msk [vmem:[%s419_s15 + $0x30] sm:$0xff] %vm458_vm0, %v849_v35  ;;  %v850_v39 = vadd.f32 %v842_v36, %v1968_v11 }
 0x3f9   : > { %855 = vst.msk [vmem:[%s419_s15 + $0x20] sm:$0xff] %vm458_vm0, %v847_v37  ;;  %v848_v40 = vadd.f32 %v840_v38, %v1957_v7 }
 0x3fa   : > { %858 = vst.msk [vmem:[%s419_s15 + $0x38] sm:$0xff] %vm458_vm0, %v850_v39 }
 0x3fb   : > { %856 = vst.msk [vmem:[%s419_s15 + $0x28] sm:$0xff] %vm458_vm0, %v848_v40 }
 0x3fc   : > { %1536 = shalt.err (!%p1533_p7)
}
 0x3fd   : > { %s1537_s0 = scalar_lea.hbm %s2091_s20, 1024  ;;  %s1541_s12 = scalar_lea.hbm %s2153_s6, 2048 }
 0x3fe   : > { %p1538_p12 = scmp.ne.s32.totalorder %s2091_s20, %s1537_s0  ;;  %p1542_p2 = scmp.lt.u32.totalorder %s2091_s20, %s2153_s6 }
 0x3ff   : > { %p1543_p10 = scmp.lt.u32.totalorder %s1541_s12, %s1537_s0  ;;  %p1545_p11 = scmp.lt.u32.totalorder %s1537_s0, %s2091_s20 }
 0x400   : > { %p1539_p13 = pnand %p1538_p12, %p2200_p4 }
 0x401   : > { %p1544_p3 = por %p1543_p10, %p1542_p2 }
 0x402   : > { %p1540_p9 = pneg %p1539_p13 }
 0x403   : > { %p1546_p1 = por %p1545_p11, %p1544_p3 }
 0x405   : > { %p1547_p6 = pnand %p1546_p1, %p1540_p9 }
 0x407   : > { %1550 = shalt.err (!%p1547_p6)
}
 0x408   : > { %1222 = dma.vmem_to_hbm [thread:$0]  (%p2200_p4), %s2093_s22, 1024, %s2091_s20, %s876_s4, %s1629_s23, %s1629_s23, %s1630_s8  }
 0x409 PF: > { %s2201_s13 = sld [smem:[#allocation21_spill]]  ;;  %s929_s25 = sand.u32 1, %s1597_s26  }
 0x40a   : > { %p2202_p8 = scmp.ne.s32.totalorder %s2177_s11, 0  ;;  %s930_s15 = scalar_lea.sflag [#allocation5], %s929_s25 }
 0x40f   : > { %p2203_p0 = scmp.ge.s32.totalorder %s2201_s13, 2 }
 0x411   : > { %p1244_p5 = pnand %p2203_p0, %p2202_p8 }
 0x413   : > { %1588 = dma.done.wait (!%p1244_p5), %s930_s15, 1024  }
 0x414   : > { %1590 = vsyncadd (!%p1244_p5), %s930_s15, 4294966272  ;;  %s939_s19 = scalar_lea.sflag [#allocation14], %s929_s25 }
 0x415   : > { %1592 = dma.done.wait (!%p1244_p5), %s939_s19, 1024  }
 0x416   : > { %1594 = vsyncadd (!%p1244_p5), %s939_s19, 4294966272  ;;  %s32_s0 = sadd.s32 1, %s2201_s13   ;;  %s2204_s18 = sld [smem:[#allocation20_spill]] }
 0x417   : > { %p29_p7 = scmp.ge.s32.totalorder %s32_s0, 4   ;;  %s2205_s28 = sld [smem:[#allocation23_spill]] }
 0x418   : > { %s2206_s23 = sld [smem:[#allocation22_spill]]  ;;  %s2207_s26 = smov %s1601_s27 }
 0x419   : > { %s2209_s29 = smov %s1613_s30  ;;  %31 = sbr.rel (!%p29_p7) target bundleno = 15 (0xf), region = 138 }
 0x41c   : > { %s2208_s27 = smov %s2204_s18 }
 0x41e   : > { %s2210_s30 = smov %s2206_s23 }
 0x420   :  { %944 = vsyncpa [#allocation4], 1 }
 0x421   :  { %946 = vsyncpa [#allocation4 + $0x1], 1 }
 0x422   :  { %947 = vsyncpa [#allocation7], 1 }
 0x423   :  { %949 = vsyncpa [#allocation7 + $0x1], 1 }
 0x424   :  { %950 = vsyncpa [#allocation10], 1 }
 0x425   :  { %951 = vsyncpa [#allocation5], 1 }
 0x426   :  { %953 = vsyncpa [#allocation5 + $0x1], 1 }
 0x427   :  { %954 = vsyncpa [#allocation14], 1 }
 0x428   :  { %956 = vsyncpa [#allocation14 + $0x1], 1 }

</bundles_post_ra>
